<compile_context>
chip_gen: v7x
topology: tpu7x:2x2x1
jax: 0.10.0
libtpu: 0.0.40
codegen_flags: <defaults>
</compile_context>

<pallas_src>
import math

import jax
import jax.numpy as jnp
from jax.experimental import pallas as pl
from jax.experimental.pallas import tpu as pltpu


_INV_SQRT2 = 0.7071067811865476


def _gelu_exact(x):
    # PyTorch nn.GELU() default is the exact (erf) formulation.
    return 0.5 * x * (1.0 + jax.lax.erf(x * _INV_SQRT2))


def _round_up(n, m):
    return ((n + m - 1) // m) * m


def ffn_kernel(x_ref, w1_ref, b1_ref, w2_ref, b2_ref, o_ref, acc_ref):
    """One (row-tile i, hidden-tile h) step of y = GELU(x@W1 + b1) @ W2 + b2."""
    h_idx = pl.program_id(1)

    @pl.when(h_idx == 0)
    def _():
        acc_ref[...] = jnp.zeros_like(acc_ref)

    # First matmul + bias + exact GELU, all in f32.
    hid = jnp.dot(x_ref[...], w1_ref[...], preferred_element_type=jnp.float32)
    hid = _gelu_exact(hid + b1_ref[...])

    # Single cast right before the second matmul (no-op for f32 weights).
    acc_ref[...] += jnp.dot(hid.astype(w2_ref.dtype), w2_ref[...],
                            preferred_element_type=jnp.float32)

    @pl.when(h_idx == pl.num_programs(1) - 1)
    def _():
        o_ref[...] = (acc_ref[...] + b2_ref[...]).astype(o_ref.dtype)


def _select_tiles(N, Dp, Hmin, itemsize, *, tm_target=256, th_target=512,
                  vmem_budget=40 * 1024 * 1024):
    """Pick (tm, th) so the double-buffered working set fits the VMEM budget."""
    tm = min(tm_target, _round_up(N, 8))
    # Keep >= 2 row tiles when the problem allows (feeds both v7x TensorCores).
    while tm > 8 and (N + tm - 1) // tm < 2:
        tm = max(8, _round_up(tm // 2, 8))
    th = min(_round_up(th_target, 128), Hmin)

    def vmem_bytes(tm_, th_):
        x_t = 2 * tm_ * Dp * itemsize        # double-buffered x row tile
        w_t = 2 * 2 * Dp * th_ * itemsize    # double-buffered W1 + W2 hidden tiles
        o_t = 2 * tm_ * Dp * itemsize        # double-buffered output tile
        acc = tm_ * Dp * 4                   # f32 accumulator (scratch)
        bias = 2 * (th_ + Dp) * itemsize     # b1 tile + resident b2
        return x_t + w_t + o_t + acc + bias

    while th > 128 and vmem_bytes(tm, th) > vmem_budget:
        th = max(128, _round_up(th // 2, 128))
    while tm > 8 and vmem_bytes(tm, th) > vmem_budget:
        tm = max(8, _round_up(tm // 2, 8))
    return tm, th


def feed_forward(x, w1, b1, w2, b2, *, tm=256, th=512):
    """x: (B, S, D). w1: (D, H), b1: (H,), w2: (H, D), b2: (D,). Returns (B, S, D)."""
    B, S, D = x.shape
    H = w1.shape[1]
    N = B * S
    dtype = x.dtype
    itemsize = max(jnp.dtype(dtype).itemsize, jnp.dtype(w1.dtype).itemsize)

    # Lane-dense padding: last dims must be multiples of 128.
    Dp = _round_up(D, 128)
    Hmin = _round_up(H, 128)
    tm, th = _select_tiles(N, Dp, Hmin, itemsize, tm_target=tm, th_target=th)
    Hp = _round_up(H, th)
    Np = _round_up(N, tm)

    xf = x.reshape(N, D)
    if (Np, Dp) != (N, D):
        xf = jnp.pad(xf, ((0, Np - N), (0, Dp - D)))
    w1p = jnp.pad(w1, ((0, Dp - D), (0, Hp - H))) if (Dp, Hp) != (D, H) else w1
    w2p = jnp.pad(w2, ((0, Hp - H), (0, Dp - D))) if (Hp, Dp) != (H, D) else w2
    b1p = jnp.pad(b1, (0, Hp - H)).reshape(1, Hp)
    b2p = jnp.pad(b2, (0, Dp - D)).reshape(1, Dp)

    grid = (Np // tm, Hp // th)  # (row tiles: parallel, hidden tiles: reduction, last)

    out_itemsize = jnp.dtype(dtype).itemsize
    bytes_accessed = (xf.size * xf.dtype.itemsize
                      + w1p.size * w1p.dtype.itemsize
                      + w2p.size * w2p.dtype.itemsize
                      + b1p.size * b1p.dtype.itemsize
                      + b2p.size * b2p.dtype.itemsize
                      + Np * Dp * out_itemsize)
    cost = pl.CostEstimate(flops=4 * N * D * H,          # two N x D x H matmuls
                           transcendentals=N * H,        # erf per hidden activation
                           bytes_accessed=bytes_accessed)

    out = pl.pallas_call(
        ffn_kernel,
        out_shape=jax.ShapeDtypeStruct((Np, Dp), dtype),
        grid_spec=pltpu.PrefetchScalarGridSpec(
            num_scalar_prefetch=0,
            grid=grid,
            in_specs=[
                pl.BlockSpec((tm, Dp), lambda i, h: (i, 0)),   # x row tile (reused over h)
                pl.BlockSpec((Dp, th), lambda i, h: (0, h)),   # W1 hidden-column tile
                pl.BlockSpec((1, th), lambda i, h: (0, h)),    # b1 tile
                pl.BlockSpec((th, Dp), lambda i, h: (h, 0)),   # W2 hidden-row tile
                pl.BlockSpec((1, Dp), lambda i, h: (0, 0)),    # b2 (tiny, resident)
            ],
            out_specs=pl.BlockSpec((tm, Dp), lambda i, h: (i, 0)),
            scratch_shapes=[pltpu.VMEM((tm, Dp), jnp.float32)],  # f32 accumulator
        ),
        compiler_params=pltpu.CompilerParams(
            dimension_semantics=("parallel", "arbitrary"),
            vmem_limit_bytes=64 * 1024 * 1024,
        ),
        cost_estimate=cost,
    )(xf, w1p, b1p, w2p, b2p)

    return out[:N, :D].reshape(B, S, D)


def init_params(key, dim, hidden_dim, dtype=jnp.float32):
    # Deterministic init mimicking PyTorch nn.Linear (uniform +/- 1/sqrt(fan_in)).
    k1, k2, k3, k4 = jax.random.split(key, 4)
    lim1 = 1.0 / math.sqrt(dim)
    lim2 = 1.0 / math.sqrt(hidden_dim)
    w1 = jax.random.uniform(k1, (dim, hidden_dim), dtype, -lim1, lim1)   # (in, out)
    b1 = jax.random.uniform(k2, (hidden_dim,), dtype, -lim1, lim1)
    w2 = jax.random.uniform(k3, (hidden_dim, dim), dtype, -lim2, lim2)   # (in, out)
    b2 = jax.random.uniform(k4, (dim,), dtype, -lim2, lim2)
    return w1, b1, w2, b2


if __name__ == "__main__":
    key = jax.random.PRNGKey(0)
    B, S, dim, hidden_dim = 2, 8, 32, 64

    kx, kp = jax.random.split(key)
    x = jax.random.normal(kx, (B, S, dim), jnp.float32)
    w1, b1, w2, b2 = init_params(kp, dim, hidden_dim)

    y = feed_forward(x, w1, b1, w2, b2)
    y = jax.block_until_ready(y)

    # Pure-JAX reference for sanity.
    h_ref = _gelu_exact(x @ w1 + b1)
    y_ref = h_ref @ w2 + b2
    assert y.shape == (B, S, dim)
    assert jnp.allclose(y, y_ref, atol=1e-5, rtol=1e-5)

    print("KERNEL_OK")
</pallas_src>

<mosaic_0001>
module attributes {stable_mosaic.version = 11 : i64} {
  func.func @ffn_kernel(%arg0: i32, %arg1: i32, %arg2: memref<8x128xf32, #tpu.memory_space<vmem>>, %arg3: memref<128x128xf32, #tpu.memory_space<vmem>>, %arg4: memref<1x128xf32, #tpu.memory_space<vmem>>, %arg5: memref<128x128xf32, #tpu.memory_space<vmem>>, %arg6: memref<1x128xf32, #tpu.memory_space<vmem>>, %arg7: memref<8x128xf32, #tpu.memory_space<vmem>>, %arg8: memref<8x128xf32, #tpu.memory_space<vmem>>) attributes {dimension_semantics = [#tpu.dimension_semantics<parallel>, #tpu.dimension_semantics<arbitrary>], iteration_bounds = array<i64: 2, 1>, scalar_prefetch = 0 : i64, scratch_operands = 1 : i64, tpu.core_type = #tpu.core_type<tc>, window_params = [{transform_indices = @transform_0, window_bounds = array<i64: 8, 128>}, {transform_indices = @transform_1, window_bounds = array<i64: 128, 128>}, {transform_indices = @transform_2, window_bounds = array<i64: 1, 128>}, {transform_indices = @transform_3, window_bounds = array<i64: 128, 128>}, {pipeline_mode = #tpu.pipeline_mode<synchronous>, transform_indices = @transform_4, window_bounds = array<i64: 1, 128>}, {transform_indices = @transform_5, window_bounds = array<i64: 8, 128>}]} {
    %c0_i32 = arith.constant 0 : i32
    %0 = arith.cmpi eq, %arg1, %c0_i32 : i32
    %1 = arith.extui %0 : i1 to i32
    %c0_i32_0 = arith.constant 0 : i32
    %2 = arith.cmpi ne, %1, %c0_i32_0 : i32
    scf.if %2 {
      %cst_18 = arith.constant 0.000000e+00 : f32
      %25 = vector.broadcast %cst_18 : f32 to vector<8x128xf32>
      %c0_19 = arith.constant 0 : index
      %c0_20 = arith.constant 0 : index
      %26 = vector.load %arg8[%c0_19, %c0_20] : memref<8x128xf32, #tpu.memory_space<vmem>>, vector<8x128xf32>
      tpu.vector_store %arg8[%c0_19, %c0_20], %25 {strides = array<i32>} : memref<8x128xf32, #tpu.memory_space<vmem>>, vector<8x128xf32>,
    } else {
    }
    %c0 = arith.constant 0 : index
    %c0_1 = arith.constant 0 : index
    %3 = vector.load %arg2[%c0, %c0_1] : memref<8x128xf32, #tpu.memory_space<vmem>>, vector<8x128xf32>
    %c0_2 = arith.constant 0 : index
    %c0_3 = arith.constant 0 : index
    %4 = vector.load %arg3[%c0_2, %c0_3] : memref<128x128xf32, #tpu.memory_space<vmem>>, vector<128x128xf32>
    %cst = arith.constant dense<0.000000e+00> : vector<8x128xf32>
    %5 = tpu.matmul %3, %4, %cst {dimension_numbers = #tpu.dot_dimension_numbers<[1], [0], [0], [1], [0, 0, 1, 1], [], []>} : vector<8x128xf32>, vector<128x128xf32>, vector<8x128xf32> -> vector<8x128xf32>
    %c0_4 = arith.constant 0 : index
    %c0_5 = arith.constant 0 : index
    %6 = vector.load %arg4[%c0_4, %c0_5] : memref<1x128xf32, #tpu.memory_space<vmem>>, vector<1x128xf32>
    %7 = vector.broadcast %6 : vector<1x128xf32> to vector<8x128xf32>
    %8 = arith.addf %5, %7 : vector<8x128xf32>
    %cst_6 = arith.constant 5.000000e-01 : f32
    %9 = vector.broadcast %cst_6 : f32 to vector<8x128xf32>
    %10 = arith.mulf %9, %8 : vector<8x128xf32>
    %cst_7 = arith.constant 0.707106769 : f32
    %11 = vector.broadcast %cst_7 : f32 to vector<8x128xf32>
    %12 = arith.mulf %8, %11 : vector<8x128xf32>
    %13 = math.erf %12 : vector<8x128xf32>
    %cst_8 = arith.constant 1.000000e+00 : f32
    %14 = vector.broadcast %cst_8 : f32 to vector<8x128xf32>
    %15 = arith.addf %14, %13 : vector<8x128xf32>
    %16 = arith.mulf %10, %15 : vector<8x128xf32>
    %c0_9 = arith.constant 0 : index
    %c0_10 = arith.constant 0 : index
    %17 = vector.load %arg8[%c0_9, %c0_10] : memref<8x128xf32, #tpu.memory_space<vmem>>, vector<8x128xf32>
    %c0_11 = arith.constant 0 : index
    %c0_12 = arith.constant 0 : index
    %18 = vector.load %arg5[%c0_11, %c0_12] : memref<128x128xf32, #tpu.memory_space<vmem>>, vector<128x128xf32>
    %cst_13 = arith.constant dense<0.000000e+00> : vector<8x128xf32>
    %19 = tpu.matmul %16, %18, %cst_13 {dimension_numbers = #tpu.dot_dimension_numbers<[1], [0], [0], [1], [0, 0, 1, 1], [], []>} : vector<8x128xf32>, vector<128x128xf32>, vector<8x128xf32> -> vector<8x128xf32>
    %20 = arith.addf %17, %19 : vector<8x128xf32>
    %c0_14 = arith.constant 0 : index
    %c0_15 = arith.constant 0 : index
    %21 = vector.load %arg8[%c0_14, %c0_15] : memref<8x128xf32, #tpu.memory_space<vmem>>, vector<8x128xf32>
    tpu.vector_store %arg8[%c0_14, %c0_15], %20 {strides = array<i32>} : memref<8x128xf32, #tpu.memory_space<vmem>>, vector<8x128xf32>,
    %c0_i32_16 = arith.constant 0 : i32
    %22 = arith.cmpi eq, %arg1, %c0_i32_16 : i32
    %23 = arith.extui %22 : i1 to i32
    %c0_i32_17 = arith.constant 0 : i32
    %24 = arith.cmpi ne, %23, %c0_i32_17 : i32
    scf.if %24 {
      %c0_18 = arith.constant 0 : index
      %c0_19 = arith.constant 0 : index
      %25 = vector.load %arg8[%c0_18, %c0_19] : memref<8x128xf32, #tpu.memory_space<vmem>>, vector<8x128xf32>
      %c0_20 = arith.constant 0 : index
      %c0_21 = arith.constant 0 : index
      %26 = vector.load %arg6[%c0_20, %c0_21] : memref<1x128xf32, #tpu.memory_space<vmem>>, vector<1x128xf32>
      %27 = vector.broadcast %26 : vector<1x128xf32> to vector<8x128xf32>
      %28 = arith.addf %25, %27 : vector<8x128xf32>
      %c0_22 = arith.constant 0 : index
      %c0_23 = arith.constant 0 : index
      %29 = vector.load %arg7[%c0_22, %c0_23] : memref<8x128xf32, #tpu.memory_space<vmem>>, vector<8x128xf32>
      tpu.vector_store %arg7[%c0_22, %c0_23], %28 {strides = array<i32>} : memref<8x128xf32, #tpu.memory_space<vmem>>, vector<8x128xf32>,
    } else {
    }
    return
  }
  func.func @transform_0(%arg0: i32, %arg1: i32) -> (i32, i32) {
    %c0_i32 = arith.constant 0 : i32
    %c0_i32_0 = arith.constant 0 : i32
    return %arg0, %c0_i32 : i32, i32
  }
  func.func @transform_1(%arg0: i32, %arg1: i32) -> (i32, i32) {
    %c0_i32 = arith.constant 0 : i32
    %c0_i32_0 = arith.constant 0 : i32
    return %c0_i32, %arg1 : i32, i32
  }
  func.func @transform_2(%arg0: i32, %arg1: i32) -> (i32, i32) {
    %c0_i32 = arith.constant 0 : i32
    %c0_i32_0 = arith.constant 0 : i32
    return %c0_i32, %arg1 : i32, i32
  }
  func.func @transform_3(%arg0: i32, %arg1: i32) -> (i32, i32) {
    %c0_i32 = arith.constant 0 : i32
    %c0_i32_0 = arith.constant 0 : i32
    return %arg1, %c0_i32 : i32, i32
  }
  func.func @transform_4(%arg0: i32, %arg1: i32) -> (i32, i32) {
    %c0_i32 = arith.constant 0 : i32
    %c0_i32_0 = arith.constant 0 : i32
    %c0_i32_1 = arith.constant 0 : i32
    return %c0_i32, %c0_i32_0 : i32, i32
  }
  func.func @transform_5(%arg0: i32, %arg1: i32) -> (i32, i32) {
    %c0_i32 = arith.constant 0 : i32
    %c0_i32_0 = arith.constant 0 : i32
    return %arg0, %c0_i32 : i32, i32
  }
}

</mosaic_0001>

<bundles_post_ra>
// kernel: tpu_custom_call.1
= control target key start
LH: loop header
LB: loop body
LE: loop exit
PB: predicated region body
PF: predicated region fallthrough
CT: control target
= control target key end

     0   :  { %10 = vsyncpa [#allocation4], 0  ;;  %s1549_s0 = inlined_call_operand.hbm [shape: f32[16,128], index: 0, kind: input, shape index: {}]   ;;  %s1550_s1 = inlined_call_operand.hbm [shape: f32[128,128], index: 1, kind: input, shape index: {}]   ;;  %s1551_s2 = inlined_call_operand.hbm [shape: f32[1,128], index: 2, kind: input, shape index: {}]   ;;  %s1552_s3 = inlined_call_operand.hbm [shape: f32[128,128], index: 3, kind: input, shape index: {}]   ;;  %s1553_s4 = inlined_call_operand.hbm [shape: f32[1,128], index: 4, kind: input, shape index: {}]   ;;  %s1554_s5 = inlined_call_operand.hbm [shape: f32[16,128], index: 5, kind: output, shape index: {}]  }
   0x1   :  { %12 = vsyncpa [#allocation4 + $0x1], 0 }
   0x2   :  { %13 = vsyncpa [#allocation7], 0 }
   0x3   :  { %14 = vsyncpa [#allocation10], 0 }
   0x4   :  { %15 = vsyncpa [#allocation5], 0 }
   0x5   :  { %17 = vsyncpa [#allocation5 + $0x1], 0  ;;  %s1231_s18 = smov 0   ;;  %s1233_s19 = smov 0  }
   0x6   :  { %s1235_s20 = smov 0   ;;  %s1237_s21 = smov 0  }
   0x7   :  { %s1239_s22 = smov 0   ;;  %s1241_s23 = smov 0  }
   0x8 LB: > { %s671_s24 = sadd.s32 4294967295, %s1188_s23   ;;  %p673_p0 = scmp.ge.s32.totalorder %s1188_s23, 1  ;;  %s1188_s23 = sphi %s1241_s23, %s23_s23   ;;  %s1184_s22 = sphi %s1239_s22, %s1578_s22   ;;  %s1180_s21 = sphi %s1237_s21, %s1577_s21   ;;  %s1176_s20 = sphi %s1235_s20, %s1576_s20   ;;  %s1172_s19 = sphi %s1233_s19, %s1575_s19   ;;  %s1168_s18 = sphi %s1231_s18, %s1574_s18  }
   0x9   : > { %p1265_p1 = scmp.eq.s32.totalorder %s671_s24, 0  ;;  %p191_p2 = scmp.lt.s32.totalorder %s1188_s23, 3 }
   0xa   : > { %s1190_s27 = smov [#allocation6]   ;;  %s1191_s30 = smov [#allocation9]  }
   0xb   : > { %s1559_s25 = scalar_select %p1265_p1, 1, 0 }
   0xc   : > { %p1270_p3 = pnand %p673_p0, %p191_p2  ;;  %s205_s28 = sshll.u32 %s1190_s27, 4  ;;  %s1274_s28 = int_to_ptr.vmem [resolvable:$true] %s205_s28 }
   0xd   : > { %s234_s6 = sshll.u32 %s1191_s30, 4  ;;  %s1192_s7 = smov [#allocation8]   ;;  %s1285_s6 = int_to_ptr.vmem [resolvable:$true] %s234_s6 }
   0xe   : > { %s1560_s26 = scalar_select %p1270_p3, 1, 0 }
   0xf   : > { %p866_p4 = pneg %p1270_p3  ;;  %s1287_s8 = sshll.u32 %s1192_s7, 4  ;;  %s222_s8 = int_to_ptr.vmem [resolvable:$true] %s1287_s8 }
  0x10   : > { %s956_s11 = scalar_lea.hbm %s1550_s1, 2048 }
  0x11   : > { %p1281_p6 = pnand %p866_p4, %p1265_p1  ;;  %p957_p7 = scmp.ne.s32.totalorder %s1550_s1, %s956_s11 }
  0x12   : > { %p963_p11 = scmp.lt.u32.totalorder %s956_s11, %s1550_s1 }
  0x13   : > { %p1297_p8 = pneg %p1281_p6 }
  0x15   : > { %p959_p9 = pnand %p1297_p8, %p957_p7 }
  0x17   : > { %p960_p10 = pneg %p959_p9 }
  0x19   : > { %p965_p12 = pnand %p963_p11, %p960_p10 }
  0x1b   : > { %968 = shalt.err (!%p965_p12)
}
  0x1c   : > { %s969_s17 = scalar_lea.vmem %s1274_s28, 2048  ;;  %p977_p4 = scmp.lt.s32.totalorder %s1274_s28, %s1274_s28 }
  0x1d   : > { %p970_p13 = scmp.ne.s32.totalorder %s1274_s28, %s969_s17  ;;  %p978_p5 = scmp.lt.s32.totalorder %s969_s17, %s969_s17 }
  0x1f   : > { %p972_p0 = pnand %p970_p13, %p1297_p8  ;;  %p979_p7 = por %p978_p5, %p977_p4 }
  0x21   : > { %p973_p2 = pneg %p972_p0 }
  0x23   : > { %p980_p9 = pnand %p979_p7, %p973_p2 }
  0x25   : > { %983 = shalt.err (!%p980_p9)
}
  0x26   : > { %s1193_s27 = smov 128   ;;  %s1194_s30 = smov 8  }
  0x27   : > { %869 = dma.hbm_to_vmem [thread:$0]  (!%p1281_p6), %s1550_s1, 2048, %s1274_s28, [#allocation7], %s1193_s27, %s1193_s27, %s1194_s30  }
  0x28   : > { %s984_s12 = scalar_lea.hbm %s1552_s3, 2048 }
  0x29   : > { %p985_p5 = scmp.ne.s32.totalorder %s1552_s3, %s984_s12  ;;  %p991_p12 = scmp.lt.u32.totalorder %s984_s12, %s1552_s3 }
  0x2b   : > { %p987_p10 = pnand %p985_p5, %p1297_p8 }
  0x2d   : > { %p988_p11 = pneg %p987_p10 }
  0x2f   : > { %p993_p13 = pnand %p991_p12, %p988_p11 }
  0x31   : > { %996 = shalt.err (!%p993_p13)
}
  0x32   : > { %s997_s28 = scalar_lea.vmem %s1285_s6, 2048  ;;  %p1005_p7 = scmp.lt.s32.totalorder %s1285_s6, %s1285_s6 }
  0x33   : > { %p998_p0 = scmp.ne.s32.totalorder %s1285_s6, %s997_s28  ;;  %p1006_p9 = scmp.lt.s32.totalorder %s997_s28, %s997_s28 }
  0x35   : > { %p1000_p2 = pnand %p998_p0, %p1297_p8  ;;  %p1007_p5 = por %p1006_p9, %p1005_p7 }
  0x37   : > { %p1001_p4 = pneg %p1000_p2 }
  0x39   : > { %p1008_p10 = pnand %p1007_p5, %p1001_p4 }
  0x3b   : > { %1011 = shalt.err (!%p1008_p10)
}
  0x3c   : > { %875 = dma.hbm_to_vmem [thread:$0]  (!%p1281_p6), %s1552_s3, 2048, %s1285_s6, [#allocation10], %s1193_s27, %s1193_s27, %s1194_s30  }
  0x3d   : > { %s1012_s12 = scalar_lea.hbm %s1551_s2, 16 }
  0x3e   : > { %p1013_p11 = scmp.ne.s32.totalorder %s1551_s2, %s1012_s12  ;;  %p1019_p0 = scmp.lt.u32.totalorder %s1012_s12, %s1551_s2 }
  0x40   : > { %p1015_p12 = pnand %p1013_p11, %p1297_p8 }
  0x42   : > { %p1016_p13 = pneg %p1015_p12 }
  0x44   : > { %p1021_p2 = pnand %p1019_p0, %p1016_p13 }
  0x46   : > { %1024 = shalt.err (!%p1021_p2)
}
  0x47   : > { %s1025_s28 = scalar_lea.vmem %s222_s8, 16  ;;  %s1032_s6 = scalar_lea.vmem %s222_s8, 32 }
  0x48   : > { %p1026_p4 = scmp.ne.s32.totalorder %s222_s8, %s1025_s28  ;;  %p1033_p5 = scmp.lt.s32.totalorder %s222_s8, %s222_s8 }
  0x49   : > { %p1034_p10 = scmp.lt.s32.totalorder %s1032_s6, %s1025_s28 }
  0x4a   : > { %p1028_p7 = pnand %p1026_p4, %p1297_p8 }
  0x4b   : > { %p1035_p3 = por %p1034_p10, %p1033_p5 }
  0x4c   : > { %p1029_p9 = pneg %p1028_p7 }
  0x4e   : > { %p1036_p1 = pnand %p1035_p3, %p1029_p9 }
  0x50   : > { %1039 = shalt.err (!%p1036_p1)
}
  0x51   : > { %872 = dma.hbm_to_vmem [thread:$0]  (!%p1281_p6), %s1551_s2, 16, %s222_s8, [#allocation7]  }
  0x52   : > { %s1195_s7 = smov [#allocation11]   ;;  %s1040_s12 = scalar_lea.hbm %s1553_s4, 16 }
  0x53   : > { %s248_s9 = sshll.u32 %s1195_s7, 4  ;;  %p1041_p11 = scmp.ne.s32.totalorder %s1553_s4, %s1040_s12  ;;  %s249_s9 = int_to_ptr.vmem [resolvable:$true] %s248_s9 }
  0x54   : > { %p1047_p12 = scmp.lt.u32.totalorder %s1040_s12, %s1553_s4 }
  0x55   : > { %p1043_p1 = pnand %p1041_p11, %p1297_p8 }
  0x57   : > { %p1044_p3 = pneg %p1043_p1 }
  0x59   : > { %p1049_p13 = pnand %p1047_p12, %p1044_p3 }
  0x5b   : > { %1052 = shalt.err (!%p1049_p13)
}
  0x5c   : > { %s1053_s8 = scalar_lea.vmem %s249_s9, 16  ;;  %s1060_s28 = scalar_lea.vmem %s249_s9, 32 }
  0x5d   : > { %p1054_p0 = scmp.ne.s32.totalorder %s249_s9, %s1053_s8  ;;  %p1061_p7 = scmp.lt.s32.totalorder %s249_s9, %s249_s9 }
  0x5e   : > { %p1062_p9 = scmp.lt.s32.totalorder %s1060_s28, %s1053_s8 }
  0x5f   : > { %p1056_p2 = pnand %p1054_p0, %p1297_p8 }
  0x60   : > { %p1063_p5 = por %p1062_p9, %p1061_p7 }
  0x61   : > { %p1057_p4 = pneg %p1056_p2 }
  0x63   : > { %p1064_p10 = pnand %p1063_p5, %p1057_p4 }
  0x65   : > { %1067 = shalt.err (!%p1064_p10)
}
  0x66   : > { %878 = dma.hbm_to_vmem [thread:$0]  (!%p1281_p6), %s1553_s4, 16, %s249_s9, [#allocation10]  }
  0x67   : > { %s672_s14 = sadd.s32 4294967294, %s1188_s23   ;;  %s35_s30 = sadd.s32 1, %s1184_s22 }
  0x68   : > { %p37_p8 = scmp.ge.s32.totalorder %s35_s30, 2  ;;  %s42_s29 = sadd.s32 1, %s1176_s20 }
  0x69   : > { %p49_p11 = scmp.ne.s32.totalorder %s1176_s20, %s1172_s19  ;;  %p50_p1 = scmp.eq.s32.totalorder %s1188_s23, 0 }
  0x6a   : > { %s1580_s30 = smov (%p37_p8, %s35_s30), 0  ;;  %p55_p12 = scmp.ne.s32.totalorder %s1172_s19, %s1168_s18 }
  0x6b   : > { %p1386_p3 = por %p50_p1, %p49_p11  ;;  %s39_s9 = ssub.s32 %s1184_s22, %s1580_s30 }
  0x6c   : > { %p178_p6 = scmp.eq.s32.totalorder %s671_s24, 1  ;;  %p40_p13 = scmp.eq.s32.totalorder %s39_s9, 0 }
  0x6d   : > { %p1564_p0 = scmp.ne.s32.totalorder %s1559_s25, 0  ;;  %p184_p7 = scmp.eq.s32.totalorder %s672_s14, 1 }
  0x6e   : > { %p1402_p4 = por %p178_p6, %p49_p11  ;;  %p891_p5 = scmp.lt.s32.totalorder %s1188_s23, 2 }
  0x6f   : > { %p1398_p2 = por %p1564_p0, %p55_p12  ;;  %p1409_p9 = por %p184_p7, %p55_p12 }
  0x70   : > { %s1566_s11 = scalar_select %p1402_p4, 1, 0 }
  0x71   : > { %s1407_s12 = scalar_select %p40_p13, %s1176_s20, %s42_s29  }
  0x72   : > { %s1567_s13 = scalar_select %p1409_p9, 1, 0 }
  0x73   : > { %s259_s15 = sand.u32 1, %s1176_s20   ;;  %s680_s24 = sshll.u32 %s1184_s22, 7 }
  0x74   : > { %s679_s16 = sshll.u32 %s259_s15, 3  ;;  %s1419_s28 = scalar_lea.hbm %s1549_s0, %s680_s24 }
  0x75   : > { %s263_s6 = scalar_lea.vmem [#allocation3], %s679_s16  ;;  %p1423_p10 = pnand %p891_p5, %p1386_p3 }
  0x76   : > { %s270_s27 = sshll.u32 %s263_s6, 4  ;;  %s260_s29 = scalar_lea.sflag [#allocation4], %s259_s15  ;;  %s1427_s27 = int_to_ptr.vmem [resolvable:$true] %s270_s27 }
  0x77   : > { %s1068_s9 = scalar_lea.hbm %s1419_s28, 128  ;;  %p1070_p11 = pneg %p1423_p10 }
  0x78   : > { %p1069_p8 = scmp.ne.s32.totalorder %s1419_s28, %s1068_s9  ;;  %s1073_s7 = scalar_lea.hbm %s1549_s0, 256 }
  0x79   : > { %p1074_p3 = scmp.lt.u32.totalorder %s1419_s28, %s1549_s0  ;;  %p1075_p6 = scmp.lt.u32.totalorder %s1073_s7, %s1068_s9 }
  0x7a   : > { %p1071_p1 = pnand %p1070_p11, %p1069_p8  ;;  %p1077_p0 = scmp.lt.u32.totalorder %s1068_s9, %s1419_s28 }
  0x7b   : > { %p1076_p13 = por %p1075_p6, %p1074_p3 }
  0x7c   : > { %p1072_p12 = pneg %p1071_p1 }
  0x7d   : > { %p1078_p7 = por %p1077_p0, %p1076_p13 }
  0x7f   : > { %p1079_p5 = pnand %p1078_p7, %p1072_p12 }
  0x81   : > { %1082 = shalt.err (!%p1079_p5)
}
  0x82   : > { %s1083_s15 = scalar_lea.vmem %s1427_s27, 128  ;;  %s1196_s6 = smov [#allocation3]  }
  0x83   : > { %p1084_p8 = scmp.ne.s32.totalorder %s1427_s27, %s1083_s15  ;;  %s1088_s24 = sshll.u32 %s1196_s6, 4  ;;  %s1089_s24 = int_to_ptr.vmem [resolvable:$false] %s1088_s24 }
  0x84   : > { %s1090_s16 = scalar_lea.vmem %s1089_s24, 256  ;;  %p1091_p4 = scmp.lt.s32.totalorder %s1427_s27, %s1089_s24 }
  0x85   : > { %p1086_p1 = pnand %p1084_p8, %p1070_p11  ;;  %p1092_p3 = scmp.lt.s32.totalorder %s1090_s16, %s1083_s15 }
  0x87   : > { %p1087_p9 = pneg %p1086_p1  ;;  %p1093_p6 = por %p1092_p3, %p1091_p4 }
  0x89   : > { %p1094_p13 = pnand %p1093_p6, %p1087_p9 }
  0x8b   : > { %1097 = shalt.err (!%p1094_p13)
}
  0x8c   : > { %882 = dma.hbm_to_vmem [thread:$0]  (!%p1423_p10), %s1419_s28, 128, %s1427_s27, %s260_s29  }
  0x8d   : > { %p1569_p12 = scmp.ne.s32.totalorder %s1560_s26, 0 }
  0x8e   : > { %s1457_s9 = sand.u32 (!%p1569_p12), 1, %s1172_s19  }
  0x8f   : > { %279 = sbr.rel (%p1569_p12) target bundleno = 650 (0x28a), region = 40  ;;  %s682_s7 = sshll.u32 (!%p1569_p12), %s1457_s9, 3 }
  0x90   : > { %s282_s17 = scalar_lea.sflag (!%p1569_p12), [#allocation4], %s1457_s9  ;;  %s1463_s8 = scalar_lea.vmem (!%p1569_p12), [#allocation3], %s682_s7 }
  0x96   : > { %1151 = dma.done.wait (%p1398_p2), %s282_s17, 128  }
  0x97   : > { %1153 = vsyncadd (%p1398_p2), %s282_s17, 4294967168  ;;  %p1570_p4 = scmp.ne.s32.totalorder %s1559_s25, 0 }
  0x99   : > { %1155 = dma.done.wait (%p1570_p4), [#allocation7], 2064  }
  0x9a   : > { %1157 = vsyncadd (%p1570_p4), [#allocation7], 4294965232 }
  0x9b   : > { %1159 = dma.done.wait (%p1570_p4), [#allocation10], 2064  }
  0x9c   : > { %1161 = vsyncadd (%p1570_p4), [#allocation10], 4294965232  ;;  %v1197_v0 = vmov 0.0|0.0   ;;  %vm1198_vm0 = vmmov 0   ;;  %v1199_v1 = vmov 0.0   ;;  %v335_v2 = vld [vmem:[#allocation6] sm:$0xff] }
  0x9d   : > { %798 = vmatprep.subr.bf16.mxu0 %v1197_v0  ;;  %760 = vmatprep.mubr.msk.f32.mxu0 %vm1198_vm0, %v1199_v1  ;;  %v336_v3 = vld [vmem:[#allocation6 + $0x8] sm:$0xff]  ;;  %v337_v4 = vld [vmem:[#allocation6 + $0x10] sm:$0xff]  ;;  %v338_v6 = vld [vmem:[#allocation6 + $0x18] sm:$0xff]  ;;  %s691_s25 = sshll.u32 %s1180_s21, 7  ;;  %s327_s26 = scalar_lea.vmem [#allocation12], %s682_s7 }
  0x9e   : > { %822 = vmatprep.subr.bf16.mxu1 %v1197_v0  ;;  %795 = vmatprep.mubr.msk.f32.mxu1 %vm1198_vm0, %v1199_v1  ;;  %v799_v5 = vpack.c.bf16 %v336_v3, %v335_v2  ;;  %v802_v7 = vpack.c.bf16 %v338_v6, %v337_v4  ;;  %v339_v8 = vld [vmem:[#allocation6 + $0x20] sm:$0xff]  ;;  %v340_v9 = vld [vmem:[#allocation6 + $0x28] sm:$0xff]  ;;  %v436_v12 = vld [vmem:[#allocation9 + $0x10] sm:$0xff]  ;;  %s549_s10 = sshll.u32 %s327_s26, 4  ;;  %s1500_s14 = scalar_lea.hbm %s1554_s5, %s691_s25  ;;  %s1502_s10 = int_to_ptr.vmem [resolvable:$true] %s549_s10 }
  0x9f   : > { %v434_v10 = vld [vmem:[#allocation9] sm:$0xff]  ;;  %v435_v11 = vld [vmem:[#allocation9 + $0x8] sm:$0xff]  ;;  %v437_v13 = vld [vmem:[#allocation9 + $0x18] sm:$0xff]  ;;  %v805_v14 = vpack.c.bf16 %v340_v9, %v339_v8  ;;  %s536_s29 = scalar_lea.sflag [#allocation5], %s1457_s9  ;;  %s1098_s15 = scalar_lea.vmem %s1502_s10, 128 }
  0xa0   : > { %800 = vmatpush3.bf16.msra.mxu0 %v799_v5  ;;  %v823_v15 = vpack.c.bf16 %v435_v11, %v434_v10  ;;  %v341_v16 = vld [vmem:[#allocation6 + $0x30] sm:$0xff]  ;;  %v342_v17 = vld [vmem:[#allocation6 + $0x38] sm:$0xff]  ;;  %v826_v18 = vpack.c.bf16 %v437_v13, %v436_v12  ;;  %v438_v19 = vld [vmem:[#allocation9 + $0x20] sm:$0xff]  ;;  %p1099_p2 = scmp.ne.s32.totalorder %s1502_s10, %s1098_s15  ;;  %p1571_p9 = scmp.ne.s32.totalorder %s1566_s11, 0 }
  0xa1   : > { %801 = vmatprep.subr.bf16.mxu0 %v1197_v0  ;;  %v439_v20 = vld [vmem:[#allocation9 + $0x28] sm:$0xff]  ;;  %v808_v21 = vpack.c.bf16 %v342_v17, %v341_v16  ;;  %v343_v22 = vld [vmem:[#allocation6 + $0x40] sm:$0xff]  ;;  %v346_v27 = vld [vmem:[#allocation6 + $0x58] sm:$0xff]  ;;  %s1200_s21 = smov [#allocation12]  }
  0xa2   : > { %824 = vmatpush3.bf16.msra.mxu1 %v823_v15  ;;  %v344_v23 = vld [vmem:[#allocation6 + $0x48] sm:$0xff]  ;;  %v829_v24 = vpack.c.bf16 %v439_v20, %v438_v19  ;;  %v345_v26 = vld [vmem:[#allocation6 + $0x50] sm:$0xff]  ;;  %v347_v29 = vld [vmem:[#allocation6 + $0x60] sm:$0xff]  ;;  %p1100_p10 = pnand %p1099_p2, %p1571_p9  ;;  %s1102_s6 = sshll.u32 %s1200_s21, 4  ;;  %s1103_s6 = int_to_ptr.vmem [resolvable:$false] %s1102_s6 }
  0xa3   : > { %825 = vmatprep.subr.bf16.mxu1 %v1197_v0  ;;  %v811_v25 = vpack.c.bf16 %v344_v23, %v343_v22  ;;  %v814_v28 = vpack.c.bf16 %v346_v27, %v345_v26  ;;  %v348_v30 = vld [vmem:[#allocation6 + $0x68] sm:$0xff]  ;;  %v349_v32 = vld [vmem:[#allocation6 + $0x70] sm:$0xff]  ;;  %v350_v33 = vld [vmem:[#allocation6 + $0x78] sm:$0xff]  ;;  %s1104_s24 = scalar_lea.vmem %s1103_s6, 256  ;;  %p1105_p0 = scmp.lt.s32.totalorder %s1502_s10, %s1103_s6 }
  0xa4   : > { %803 = vmatpush3.bf16.msra.mxu0 %v802_v7  ;;  %v817_v31 = vpack.c.bf16 %v348_v30, %v347_v29  ;;  %v820_v34 = vpack.c.bf16 %v350_v33, %v349_v32  ;;  %v334_v35 = vld [vmem:[%s1463_s8] sm:$0xff]  ;;  %v442_v39 = vld [vmem:[#allocation9 + $0x40] sm:$0xff]  ;;  %v688_v51 = vld [vmem:[#allocation8] ss:$0 sm:$0xff]  ;;  %p1101_p11 = pneg %p1100_p10  ;;  %p1106_p7 = scmp.lt.s32.totalorder %s1104_s24, %s1098_s15 }
  0xa5   : > { %804 = vmatprep.subr.bf16.mxu0 %v1197_v0  ;;  %v440_v36 = vld [vmem:[#allocation9 + $0x30] sm:$0xff]  ;;  %v441_v37 = vld [vmem:[#allocation9 + $0x38] sm:$0xff]  ;;  %v443_v40 = vld [vmem:[#allocation9 + $0x48] sm:$0xff] }
  0xa6   : > { %827 = vmatpush3.bf16.msra.mxu1 %v826_v18  ;;  %v832_v38 = vpack.c.bf16 %v441_v37, %v440_v36  ;;  %v835_v41 = vpack.c.bf16 %v443_v40, %v442_v39  ;;  %v444_v42 = vld [vmem:[#allocation9 + $0x50] sm:$0xff]  ;;  %v445_v43 = vld [vmem:[#allocation9 + $0x58] sm:$0xff]  ;;  %v446_v45 = vld [vmem:[#allocation9 + $0x60] sm:$0xff]  ;;  %p1107_p5 = por %p1106_p7, %p1105_p0 }
  0xa7   : > { %828 = vmatprep.subr.bf16.mxu1 %v1197_v0  ;;  %v838_v44 = vpack.c.bf16 %v445_v43, %v444_v42  ;;  %v447_v46 = vld [vmem:[#allocation9 + $0x68] sm:$0xff]  ;;  %v448_v48 = vld [vmem:[#allocation9 + $0x70] sm:$0xff]  ;;  %v449_v49 = vld [vmem:[#allocation9 + $0x78] sm:$0xff] }
  0xa8   : > { %806 = vmatpush3.bf16.msra.mxu0 %v805_v14  ;;  %v841_v47 = vpack.c.bf16 %v447_v46, %v446_v45  ;;  %v844_v50 = vpack.c.bf16 %v449_v49, %v448_v48  ;;  %v689_v60 = vld [vmem:[#allocation11] ss:$0 sm:$0xff]  ;;  %p1108_p8 = pnand %p1107_p5, %p1101_p11 }
  0xa9   : > { %807 = vmatprep.subr.bf16.mxu0 %v1197_v0 }
  0xaa   : > { %830 = vmatpush3.bf16.msra.mxu1 %v829_v24 }
  0xab   : > { %831 = vmatprep.subr.bf16.mxu1 %v1197_v0 }
  0xac   : > { %809 = vmatpush3.bf16.msra.mxu0 %v808_v21 }
  0xad   : > { %810 = vmatprep.subr.bf16.mxu0 %v1197_v0 }
  0xae   : > { %833 = vmatpush3.bf16.msra.mxu1 %v832_v38 }
  0xaf   : > { %834 = vmatprep.subr.bf16.mxu1 %v1197_v0 }
  0xb0   : > { %812 = vmatpush3.bf16.msra.mxu0 %v811_v25 }
  0xb1   : > { %813 = vmatprep.subr.bf16.mxu0 %v1197_v0 }
  0xb2   : > { %836 = vmatpush3.bf16.msra.mxu1 %v835_v41 }
  0xb3   : > { %837 = vmatprep.subr.bf16.mxu1 %v1197_v0 }
  0xb4   : > { %815 = vmatpush3.bf16.msra.mxu0 %v814_v28 }
  0xb5   : > { %816 = vmatprep.subr.bf16.mxu0 %v1197_v0 }
  0xb6   : > { %839 = vmatpush3.bf16.msra.mxu1 %v838_v44 }
  0xb7   : > { %840 = vmatprep.subr.bf16.mxu1 %v1197_v0 }
  0xb8   : > { %818 = vmatpush3.bf16.msra.mxu0 %v817_v31 }
  0xb9   : > { %819 = vmatprep.subr.bf16.mxu0 %v1197_v0 }
  0xba   : > { %842 = vmatpush3.bf16.msra.mxu1 %v841_v47 }
  0xbb   : > { %843 = vmatprep.subr.bf16.mxu1 %v1197_v0 }
  0xbc   : > { %821 = vmatpush3.bf16.msra.mxu0 %v820_v34 }
  0xbe   : > { %845 = vmatpush3.bf16.msra.mxu1 %v844_v50 }
  0xbf   : > { %761 = vmatmul.mubr.f32.vlgmr.msra.gmra.mrb[0].mxu0 %v334_v35 }
 0x192   : > { %v424_v52 = vpop.f32.mrb[0].mxu0 }
 0x193   : > { %v425_v53 = vadd.f32 %v688_v51, %v424_v52  ;;  %v762_v54 = vpop.f32.mrb[1].mxu0 }
 0x195   : > { %v429_v55 = vmul.f32 0.70710677, %v425_v53  ;;  %v428_v57 = vmul.f32 0.5, %v425_v53 }
 0x197   : > { %954 = verf.f32 %v429_v55 }
 0x1a1   : > { %v955_v56 = vpop.eup %954 }
 0x1a2   : > { %v431_v58 = vadd.f32 1.0, %v955_v56 }
 0x1a4   : > { %v432_v59 = vmul.f32 %v431_v58, %v428_v57 }
 0x1a6   : > { %796 = vmatmul.mubr.f32.vlgmr.msra.gmra.mrb[0].mxu1 %v432_v59 }
 0x279   : > { %v516_v61 = vpop.f32.mrb[0].mxu1 }
 0x27a   : > { %v533_v62 = vadd.f32 %v689_v60, %v516_v61  ;;  %v797_v63 = vpop.f32.mrb[1].mxu1 }
 0x27c   : > { %534 = vst [vmem:[%s327_s26] sm:$0xff] %v533_v62 }
 0x27d   : > { %1111 = shalt.err (!%p1108_p8)
}
 0x27e   : > { %s1112_s16 = scalar_lea.hbm %s1500_s14, 128  ;;  %s1116_s17 = scalar_lea.hbm %s1554_s5, 256 }
 0x27f   : > { %p1113_p1 = scmp.ne.s32.totalorder %s1500_s14, %s1112_s16  ;;  %p1117_p13 = scmp.lt.u32.totalorder %s1500_s14, %s1554_s5 }
 0x280   : > { %p1118_p12 = scmp.lt.u32.totalorder %s1116_s17, %s1112_s16  ;;  %p1120_p2 = scmp.lt.u32.totalorder %s1112_s16, %s1500_s14 }
 0x281   : > { %p1114_p3 = pnand %p1113_p1, %p1571_p9 }
 0x282   : > { %p1119_p4 = por %p1118_p12, %p1117_p13 }
 0x283   : > { %p1115_p6 = pneg %p1114_p3 }
 0x284   : > { %p1121_p10 = por %p1120_p2, %p1119_p4 }
 0x286   : > { %p1122_p11 = pnand %p1121_p10, %p1115_p6 }
 0x288   : > { %1125 = shalt.err (!%p1122_p11)
}
 0x289   : > { %864 = dma.vmem_to_hbm [thread:$0]  (%p1571_p9), %s1502_s10, 128, %s1500_s14, %s536_s29  }
 0x28a PF: > { %s561_s26 = sand.u32 1, %s1168_s18   ;;  %p1572_p0 = scmp.ne.s32.totalorder %s1567_s13, 0 }
 0x28b   : > { %p1573_p7 = scmp.ge.s32.totalorder %s1188_s23, 2  ;;  %s562_s28 = scalar_lea.sflag [#allocation5], %s561_s26 }
 0x28d   : > { %p884_p5 = pnand %p1573_p7, %p1572_p0 }
 0x28f   : > { %1163 = dma.done.wait (!%p884_p5), %s562_s28, 128  }
 0x290   : > { %1165 = vsyncadd (!%p884_p5), %s562_s28, 4294967168  ;;  %s23_s23 = sadd.s32 1, %s1188_s23   ;;  %s1574_s18 = smov %s1172_s19 }
 0x291   : > { %p20_p8 = scmp.ge.s32.totalorder %s23_s23, 4   ;;  %s1575_s19 = smov %s1176_s20 }
 0x292   : > { %s1576_s20 = smov %s1407_s12  ;;  %s1577_s21 = smov %s1184_s22 }
 0x293   : > { %s1578_s22 = smov %s1580_s30  ;;  %22 = sbr.rel (!%p20_p8) target bundleno = 8 (0x8), region = 112 }
 0x29a   :  { %567 = vsyncpa [#allocation4], 1 }
 0x29b   :  { %569 = vsyncpa [#allocation4 + $0x1], 1 }
 0x29c   :  { %570 = vsyncpa [#allocation7], 1 }
 0x29d   :  { %571 = vsyncpa [#allocation10], 1 }
 0x29e   :  { %572 = vsyncpa [#allocation5], 1 }
 0x29f   :  { %574 = vsyncpa [#allocation5 + $0x1], 1 }

</bundles_post_ra>
